<compile_context>
chip_gen: v7x
topology: tpu7x:2x2x1
jax: 0.10.0
libtpu: 0.0.40
codegen_flags: <defaults>
</compile_context>

<pallas_src>
import functools

import jax
import jax.numpy as jnp
from jax import lax
from jax.experimental import pallas as pl
from jax.experimental.pallas import tpu as pltpu
import numpy as np


# ----------------------------------------------------------------------------
# Fused Pallas kernel: the whole NormalCell, batch stacked in the M dimension.
# ----------------------------------------------------------------------------
def _normal_cell_kernel(x_ref,
                        band1_ref, sht1_ref,   # branch1 conv #1 (Cin  -> Cout)
                        band2_ref, sht2_ref,   # branch1 conv #2 (Cout -> Cout)
                        band3_ref, sht3_ref,   # branch2         (Cin  -> Cout)
                        out_ref, *, H, nb):
    """Lane-flattened layout: a row of C-channel pixels lives in W*C lanes.

    x_ref     : (nb*H, W*cin)            nb images, rows stacked along sublanes
    band*_ref : (3, W*Cin_, W*cout)      banded kron weights (one per ky),
                                         BN scale already folded in
    sht*_ref  : (1, W*cout)              BN shift tiled across W
    out_ref   : (nb*H, W*cout)           relu(branch1 + branch2), lane-dense
    """
    rows = x_ref.shape[0]                       # nb * H (static)

    def vshift(v):
        # v_dn[h] = v[h-1], v_up[h] = v[h+1]; zero rows at image boundaries
        # (replaces the zero-halo VMEM scratch of v1).
        wc = v.shape[1]
        zrow = jnp.zeros((1, wc), jnp.float32)
        v_dn = jnp.concatenate([zrow, v[:rows - 1, :]], axis=0)
        v_up = jnp.concatenate([v[1:, :], zrow], axis=0)
        if nb > 1:  # static branch: mask internal image boundaries in the block
            r = lax.broadcasted_iota(jnp.int32, (rows, 1), 0) % H
            v_dn = jnp.where(r == 0, 0.0, v_dn)
            v_up = jnp.where(r == H - 1, 0.0, v_up)
        return v_dn, v_up

    def sepconv(v, band_ref, sht_ref):
        # SAME 3x3 depthwise + 1x1 pointwise + BN(scale folded) as 3 banded
        # MXU matmuls over vertically shifted rows, then BN shift + ReLU (VPU).
        v_dn, v_up = vshift(v)
        y = jnp.dot(v_dn, band_ref[0], preferred_element_type=jnp.float32)
        y = y + jnp.dot(v, band_ref[1], preferred_element_type=jnp.float32)
        y = y + jnp.dot(v_up, band_ref[2], preferred_element_type=jnp.float32)
        return jnp.maximum(y + sht_ref[...], 0.0)

    x = x_ref[...].astype(jnp.float32)           # (rows, W*cin)

    y1 = sepconv(x, band1_ref, sht1_ref)         # branch1, conv #1 (stays in VMEM)
    b2 = sepconv(x, band3_ref, sht3_ref)         # branch2
    b1 = sepconv(y1, band2_ref, sht2_ref)        # branch1, conv #2

    # Branch merge + final ReLU, stored lane-dense (W*cout = 128 lanes).
    out_ref[...] = jnp.maximum(b1 + b2, 0.0).astype(out_ref.dtype)


# ----------------------------------------------------------------------------
# Wrapper-side weight preprocessing
# ----------------------------------------------------------------------------
def _prep_sepconv(dw, pw, scale, shift, W):
    """Build the 3 banded block weights (one per vertical tap ky).

    band[ky][(w_src*cin + c), (w_dst*cout + o)] =
        dw[3*ky + kx, c] * pw[c, o] * scale[o]   with kx = w_src - w_dst + 1,
    so   y[h] = x[h-1] @ band[0] + x[h] @ band[1] + x[h+1] @ band[2]
    reproduces the SAME-padded 3x3 depthwise conv followed by the 1x1 pointwise
    conv with BN scale folded in.
    """
    cin, cout = pw.shape
    pw_scaled = pw * scale.reshape(1, cout)                    # fold BN scale
    bands = []
    for ky in range(3):
        B = jnp.zeros((W * cin, W * cout), jnp.float32)
        for kx in range(3):
            # E[w_src, w_dst] = 1  iff  w_src = w_dst + kx - 1 (zero-pad edges free)
            E = jnp.eye(W, k=-(kx - 1), dtype=jnp.float32)
            blk = dw[3 * ky + kx].reshape(cin, 1) * pw_scaled  # (cin, cout)
            B = B + jnp.kron(E, blk)
        bands.append(B)
    band = jnp.stack(bands, axis=0)                            # (3, W*cin, W*cout)
    sht = jnp.tile(shift.reshape(1, cout), (1, W))             # (1, W*cout)
    return band, sht


def _default_images_per_block(N):
    # v7x has two TensorCores: split the batch across two grid blocks.
    # v5e/v6e are single-core: one big step (grid=(1,)) amortizes per-step
    # overhead and MXU fill/drain.
    try:
        kind = jax.devices()[0].device_kind.lower()
    except Exception:
        kind = ""
    if ("v7" in kind or "7x" in kind) and N % 2 == 0 and N >= 2:
        return N // 2
    return N


# ----------------------------------------------------------------------------
# Wrappers
# ----------------------------------------------------------------------------
def normal_cell(x_nhwc, params, *, images_per_block=None):
    """NormalCell forward, NHWC in/out, one fused pallas_call."""
    N, H, W, Cin = x_nhwc.shape
    dw1, pw1, sc1, sh1 = params["b1a"]
    dw2, pw2, sc2, sh2 = params["b1b"]
    dw3, pw3, sc3, sh3 = params["b2"]
    Cout = pw1.shape[1]

    band1, sht1 = _prep_sepconv(dw1, pw1, sc1, sh1, W)   # (3, W*Cin,  W*Cout)
    band2, sht2 = _prep_sepconv(dw2, pw2, sc2, sh2, W)   # (3, W*Cout, W*Cout)
    band3, sht3 = _prep_sepconv(dw3, pw3, sc3, sh3, W)   # (3, W*Cin,  W*Cout)

    nb = images_per_block if images_per_block is not None else _default_images_per_block(N)
    assert N % nb == 0, "images_per_block must divide the batch"
    num_blocks = N // nb

    # Free, contiguous reshape: stack the batch into the matmul M dimension.
    x_flat = x_nhwc.reshape(N * H, W * Cin)

    kernel = functools.partial(_normal_cell_kernel, H=H, nb=nb)

    def wspec(shape):  # whole-array, constant-index weight spec (DMA'd once)
        return pl.BlockSpec(shape, lambda i: (0,) * len(shape))

    weights = (band1, sht1, band2, sht2, band3, sht3)
    flops = (6 * N * H * (W * Cin) * (W * Cout)          # branch1 conv #1
             + 6 * N * H * (W * Cout) * (W * Cout)       # branch1 conv #2
             + 6 * N * H * (W * Cin) * (W * Cout))       # branch2
    bytes_accessed = 4 * (x_flat.size + N * H * W * Cout
                          + sum(int(w.size) for w in weights))
    cost = pl.CostEstimate(flops=flops, transcendentals=0,
                           bytes_accessed=bytes_accessed)

    out_flat = pl.pallas_call(
        kernel,
        out_shape=jax.ShapeDtypeStruct((N * H, W * Cout), jnp.float32),
        grid=(num_blocks,),
        in_specs=[
            pl.BlockSpec((nb * H, W * Cin), lambda i: (i, 0)),
            wspec(band1.shape), wspec(sht1.shape),
            wspec(band2.shape), wspec(sht2.shape),
            wspec(band3.shape), wspec(sht3.shape),
        ],
        out_specs=pl.BlockSpec((nb * H, W * Cout), lambda i: (i, 0)),
        compiler_params=pltpu.CompilerParams(dimension_semantics=("parallel",)),
        cost_estimate=cost,
    )(x_flat, band1, sht1, band2, sht2, band3, sht3)

    return out_flat.reshape(N, H, W, Cout)


def normal_cell_nchw(x_nchw, params):
    """Matches the PyTorch module's NCHW interface (layout glue only)."""
    x_nhwc = jnp.transpose(x_nchw, (0, 2, 3, 1))
    y = normal_cell(x_nhwc, params)
    return jnp.transpose(y, (0, 3, 1, 2))


# ----------------------------------------------------------------------------
# Deterministic parameter construction
# ----------------------------------------------------------------------------
def make_sepconv_params(key, cin, cout, eps=1e-5):
    k1, k2 = jax.random.split(key)
    dw = 0.1 * jax.random.normal(k1, (9, cin), jnp.float32)      # depthwise 3x3 (row = 3*ky+kx)
    pw = 0.1 * jax.random.normal(k2, (cin, cout), jnp.float32)   # pointwise 1x1
    gamma = jnp.ones((cout,), jnp.float32)
    beta = jnp.zeros((cout,), jnp.float32)
    running_mean = jnp.zeros((cout,), jnp.float32)
    running_var = jnp.ones((cout,), jnp.float32)
    scale = gamma / jnp.sqrt(running_var + eps)                  # (cout,)
    shift = beta - running_mean * scale                          # (cout,)
    return (dw, pw, scale, shift)


# ----------------------------------------------------------------------------
# Pure-JAX reference (NHWC) for numerical verification
# ----------------------------------------------------------------------------
def sepconv_ref(x, dw, pw, scale, shift):
    N, H, W, Cin = x.shape
    Cout = pw.shape[1]
    dw_hwio = dw.reshape(3, 3, Cin)[:, :, None, :]               # (3,3,1,Cin)
    y = lax.conv_general_dilated(
        x, dw_hwio, window_strides=(1, 1), padding=((1, 1), (1, 1)),
        dimension_numbers=("NHWC", "HWIO", "NHWC"), feature_group_count=Cin)
    y = lax.conv_general_dilated(
        y, pw.reshape(1, 1, Cin, Cout), window_strides=(1, 1), padding="VALID",
        dimension_numbers=("NHWC", "HWIO", "NHWC"))
    y = y * scale + shift
    return jnp.maximum(y, 0.0)


def normal_cell_ref(x, params):
    b1 = sepconv_ref(sepconv_ref(x, *params["b1a"]), *params["b1b"])
    b2 = sepconv_ref(x, *params["b2"])
    return jnp.maximum(b1 + b2, 0.0)


# ----------------------------------------------------------------------------
if __name__ == "__main__":
    N, H, W = 2, 16, 16
    Cin, Cout = 4, 8

    key = jax.random.PRNGKey(0)
    kx, k1, k2, k3 = jax.random.split(key, 4)

    # PyTorch-layout input (N, C, H, W)
    x_nchw = jax.random.normal(kx, (N, Cin, H, W), jnp.float32)

    params = {
        "b1a": make_sepconv_params(k1, Cin, Cout),   # branch1, conv #1
        "b1b": make_sepconv_params(k2, Cout, Cout),  # branch1, conv #2
        "b2":  make_sepconv_params(k3, Cin, Cout),   # branch2
    }

    out_nchw = jax.jit(normal_cell_nchw)(x_nchw, params)
    out_nchw = jax.block_until_ready(out_nchw)

    ref_nhwc = normal_cell_ref(jnp.transpose(x_nchw, (0, 2, 3, 1)), params)
    ref_nchw = jnp.transpose(ref_nhwc, (0, 3, 1, 2))
    np.testing.assert_allclose(np.asarray(out_nchw), np.asarray(ref_nchw),
                               rtol=1e-4, atol=1e-4)

    print("KERNEL_OK")
</pallas_src>

<mosaic_0001>
module attributes {stable_mosaic.version = 11 : i64} {
  func.func @_normal_cell_kernel(%arg0: i32, %arg1: memref<32x64xf32, #tpu.memory_space<vmem>>, %arg2: memref<3x64x128xf32, #tpu.memory_space<vmem>>, %arg3: memref<1x128xf32, #tpu.memory_space<vmem>>, %arg4: memref<3x128x128xf32, #tpu.memory_space<vmem>>, %arg5: memref<1x128xf32, #tpu.memory_space<vmem>>, %arg6: memref<3x64x128xf32, #tpu.memory_space<vmem>>, %arg7: memref<1x128xf32, #tpu.memory_space<vmem>>, %arg8: memref<32x128xf32, #tpu.memory_space<vmem>>) attributes {dimension_semantics = [#tpu.dimension_semantics<parallel>], iteration_bounds = array<i64: 1>, scalar_prefetch = 0 : i64, scratch_operands = 0 : i64, tpu.core_type = #tpu.core_type<tc>, window_params = [{transform_indices = @transform_0, window_bounds = array<i64: 32, 64>}, {pipeline_mode = #tpu.pipeline_mode<synchronous>, transform_indices = @transform_1, window_bounds = array<i64: 3, 64, 128>}, {pipeline_mode = #tpu.pipeline_mode<synchronous>, transform_indices = @transform_2, window_bounds = array<i64: 1, 128>}, {pipeline_mode = #tpu.pipeline_mode<synchronous>, transform_indices = @transform_3, window_bounds = array<i64: 3, 128, 128>}, {pipeline_mode = #tpu.pipeline_mode<synchronous>, transform_indices = @transform_4, window_bounds = array<i64: 1, 128>}, {pipeline_mode = #tpu.pipeline_mode<synchronous>, transform_indices = @transform_5, window_bounds = array<i64: 3, 64, 128>}, {pipeline_mode = #tpu.pipeline_mode<synchronous>, transform_indices = @transform_6, window_bounds = array<i64: 1, 128>}, {transform_indices = @transform_7, window_bounds = array<i64: 32, 128>}]} {
    %c0 = arith.constant 0 : index
    %c0_0 = arith.constant 0 : index
    %0 = vector.load %arg1[%c0, %c0_0] : memref<32x64xf32, #tpu.memory_space<vmem>>, vector<32x64xf32>
    %cst = arith.constant 0.000000e+00 : f32
    %1 = vector.broadcast %cst : f32 to vector<1x64xf32>
    %2 = vector.extract_strided_slice %0 {offsets = [0, 0], sizes = [31, 64], strides = [1, 1]} : vector<32x64xf32> to vector<31x64xf32>
    %3 = tpu.concatenate %1, %2 in 0 : vector<1x64xf32>, vector<31x64xf32> -> vector<32x64xf32>
    %4 = vector.extract_strided_slice %0 {offsets = [1, 0], sizes = [31, 64], strides = [1, 1]} : vector<32x64xf32> to vector<31x64xf32>
    %5 = tpu.concatenate %4, %1 in 0 : vector<31x64xf32>, vector<1x64xf32> -> vector<32x64xf32>
    %6 = tpu.iota {dimensions = array<i32: 0>} : vector<32x1xi32>
    %c16_i32 = arith.constant 16 : i32
    %c0_i32 = arith.constant 0 : i32
    %7 = arith.cmpi eq, %c16_i32, %c0_i32 : i32
    %c1_i32 = arith.constant 1 : i32
    %8 = arith.select %7, %c1_i32, %c16_i32 : i32
    %9 = vector.broadcast %8 : i32 to vector<32x1xi32>
    %10 = arith.remsi %6, %9 : vector<32x1xi32>
    %c0_i32_1 = arith.constant 0 : i32
    %11 = vector.broadcast %c0_i32_1 : i32 to vector<32x1xi32>
    %12 = arith.cmpi ne, %10, %11 : vector<32x1xi32>
    %c0_i32_2 = arith.constant 0 : i32
    %13 = vector.broadcast %c0_i32_2 : i32 to vector<32x1xi32>
    %14 = arith.cmpi slt, %10, %13 : vector<32x1xi32>
    %c0_i32_3 = arith.constant 0 : i32
    %15 = arith.cmpi slt, %8, %c0_i32_3 : i32
    %16 = vector.broadcast %15 : i1 to vector<32x1xi1>
    %17 = vector.broadcast %16 : vector<32x1xi1> to vector<32x1xi1>
    %18 = arith.xori %14, %17 : vector<32x1xi1>
    %19 = arith.andi %18, %12 : vector<32x1xi1>
    %20 = vector.broadcast %8 : i32 to vector<32x1xi32>
    %21 = arith.addi %10, %20 : vector<32x1xi32>
    %22 = arith.select %19, %21, %10 : vector<32x1xi1>, vector<32x1xi32>
    %c0_i32_4 = arith.constant 0 : i32
    %23 = vector.broadcast %c0_i32_4 : i32 to vector<32x1xi32>
    %24 = arith.cmpi eq, %22, %23 : vector<32x1xi32>
    %cst_5 = arith.constant 0.000000e+00 : f32
    %25 = vector.shape_cast %24 : vector<32x1xi1> to vector<32x1xi1>
    %26 = vector.broadcast %25 : vector<32x1xi1> to vector<32x64xi1>
    %27 = vector.broadcast %cst_5 : f32 to vector<32x64xf32>
    %28 = arith.select %26, %27, %3 : vector<32x64xi1>, vector<32x64xf32>
    %c15_i32 = arith.constant 15 : i32
    %29 = vector.broadcast %c15_i32 : i32 to vector<32x1xi32>
    %30 = arith.cmpi eq, %22, %29 : vector<32x1xi32>
    %cst_6 = arith.constant 0.000000e+00 : f32
    %31 = vector.shape_cast %30 : vector<32x1xi1> to vector<32x1xi1>
    %32 = vector.broadcast %31 : vector<32x1xi1> to vector<32x64xi1>
    %33 = vector.broadcast %cst_6 : f32 to vector<32x64xf32>
    %34 = arith.select %32, %33, %5 : vector<32x64xi1>, vector<32x64xf32>
    %c0_7 = arith.constant 0 : index
    %c0_8 = arith.constant 0 : index
    %c0_9 = arith.constant 0 : index
    %35 = vector.load %arg2[%c0_7, %c0_8, %c0_9] : memref<3x64x128xf32, #tpu.memory_space<vmem>>, vector<1x64x128xf32>
    %36 = vector.shape_cast %35 : vector<1x64x128xf32> to vector<64x128xf32>
    %cst_10 = arith.constant dense<0.000000e+00> : vector<32x128xf32>
    %37 = tpu.matmul %28, %36, %cst_10 {dimension_numbers = #tpu.dot_dimension_numbers<[1], [0], [0], [1], [0, 0, 1, 1], [], []>} : vector<32x64xf32>, vector<64x128xf32>, vector<32x128xf32> -> vector<32x128xf32>
    %c1 = arith.constant 1 : index
    %c0_11 = arith.constant 0 : index
    %c0_12 = arith.constant 0 : index
    %38 = vector.load %arg2[%c1, %c0_11, %c0_12] : memref<3x64x128xf32, #tpu.memory_space<vmem>>, vector<1x64x128xf32>
    %39 = vector.shape_cast %38 : vector<1x64x128xf32> to vector<64x128xf32>
    %cst_13 = arith.constant dense<0.000000e+00> : vector<32x128xf32>
    %40 = tpu.matmul %0, %39, %cst_13 {dimension_numbers = #tpu.dot_dimension_numbers<[1], [0], [0], [1], [0, 0, 1, 1], [], []>} : vector<32x64xf32>, vector<64x128xf32>, vector<32x128xf32> -> vector<32x128xf32>
    %41 = arith.addf %37, %40 : vector<32x128xf32>
    %c2 = arith.constant 2 : index
    %c0_14 = arith.constant 0 : index
    %c0_15 = arith.constant 0 : index
    %42 = vector.load %arg2[%c2, %c0_14, %c0_15] : memref<3x64x128xf32, #tpu.memory_space<vmem>>, vector<1x64x128xf32>
    %43 = vector.shape_cast %42 : vector<1x64x128xf32> to vector<64x128xf32>
    %cst_16 = arith.constant dense<0.000000e+00> : vector<32x128xf32>
    %44 = tpu.matmul %34, %43, %cst_16 {dimension_numbers = #tpu.dot_dimension_numbers<[1], [0], [0], [1], [0, 0, 1, 1], [], []>} : vector<32x64xf32>, vector<64x128xf32>, vector<32x128xf32> -> vector<32x128xf32>
    %45 = arith.addf %41, %44 : vector<32x128xf32>
    %c0_17 = arith.constant 0 : index
    %c0_18 = arith.constant 0 : index
    %46 = vector.load %arg3[%c0_17, %c0_18] : memref<1x128xf32, #tpu.memory_space<vmem>>, vector<1x128xf32>
    %47 = vector.broadcast %46 : vector<1x128xf32> to vector<32x128xf32>
    %48 = arith.addf %45, %47 : vector<32x128xf32>
    %cst_19 = arith.constant 0.000000e+00 : f32
    %49 = vector.broadcast %cst_19 : f32 to vector<32x128xf32>
    %50 = arith.maximumf %48, %49 : vector<32x128xf32>
    %cst_20 = arith.constant 0.000000e+00 : f32
    %51 = vector.broadcast %cst_20 : f32 to vector<1x64xf32>
    %52 = vector.extract_strided_slice %0 {offsets = [0, 0], sizes = [31, 64], strides = [1, 1]} : vector<32x64xf32> to vector<31x64xf32>
    %53 = tpu.concatenate %51, %52 in 0 : vector<1x64xf32>, vector<31x64xf32> -> vector<32x64xf32>
    %54 = vector.extract_strided_slice %0 {offsets = [1, 0], sizes = [31, 64], strides = [1, 1]} : vector<32x64xf32> to vector<31x64xf32>
    %55 = tpu.concatenate %54, %51 in 0 : vector<31x64xf32>, vector<1x64xf32> -> vector<32x64xf32>
    %56 = tpu.iota {dimensions = array<i32: 0>} : vector<32x1xi32>
    %c16_i32_21 = arith.constant 16 : i32
    %c0_i32_22 = arith.constant 0 : i32
    %57 = arith.cmpi eq, %c16_i32_21, %c0_i32_22 : i32
    %c1_i32_23 = arith.constant 1 : i32
    %58 = arith.select %57, %c1_i32_23, %c16_i32_21 : i32
    %59 = vector.broadcast %58 : i32 to vector<32x1xi32>
    %60 = arith.remsi %56, %59 : vector<32x1xi32>
    %c0_i32_24 = arith.constant 0 : i32
    %61 = vector.broadcast %c0_i32_24 : i32 to vector<32x1xi32>
    %62 = arith.cmpi ne, %60, %61 : vector<32x1xi32>
    %c0_i32_25 = arith.constant 0 : i32
    %63 = vector.broadcast %c0_i32_25 : i32 to vector<32x1xi32>
    %64 = arith.cmpi slt, %60, %63 : vector<32x1xi32>
    %c0_i32_26 = arith.constant 0 : i32
    %65 = arith.cmpi slt, %58, %c0_i32_26 : i32
    %66 = vector.broadcast %65 : i1 to vector<32x1xi1>
    %67 = vector.broadcast %66 : vector<32x1xi1> to vector<32x1xi1>
    %68 = arith.xori %64, %67 : vector<32x1xi1>
    %69 = arith.andi %68, %62 : vector<32x1xi1>
    %70 = vector.broadcast %58 : i32 to vector<32x1xi32>
    %71 = arith.addi %60, %70 : vector<32x1xi32>
    %72 = arith.select %69, %71, %60 : vector<32x1xi1>, vector<32x1xi32>
    %c0_i32_27 = arith.constant 0 : i32
    %73 = vector.broadcast %c0_i32_27 : i32 to vector<32x1xi32>
    %74 = arith.cmpi eq, %72, %73 : vector<32x1xi32>
    %cst_28 = arith.constant 0.000000e+00 : f32
    %75 = vector.shape_cast %74 : vector<32x1xi1> to vector<32x1xi1>
    %76 = vector.broadcast %75 : vector<32x1xi1> to vector<32x64xi1>
    %77 = vector.broadcast %cst_28 : f32 to vector<32x64xf32>
    %78 = arith.select %76, %77, %53 : vector<32x64xi1>, vector<32x64xf32>
    %c15_i32_29 = arith.constant 15 : i32
    %79 = vector.broadcast %c15_i32_29 : i32 to vector<32x1xi32>
    %80 = arith.cmpi eq, %72, %79 : vector<32x1xi32>
    %cst_30 = arith.constant 0.000000e+00 : f32
    %81 = vector.shape_cast %80 : vector<32x1xi1> to vector<32x1xi1>
    %82 = vector.broadcast %81 : vector<32x1xi1> to vector<32x64xi1>
    %83 = vector.broadcast %cst_30 : f32 to vector<32x64xf32>
    %84 = arith.select %82, %83, %55 : vector<32x64xi1>, vector<32x64xf32>
    %c0_31 = arith.constant 0 : index
    %c0_32 = arith.constant 0 : index
    %c0_33 = arith.constant 0 : index
    %85 = vector.load %arg6[%c0_31, %c0_32, %c0_33] : memref<3x64x128xf32, #tpu.memory_space<vmem>>, vector<1x64x128xf32>
    %86 = vector.shape_cast %85 : vector<1x64x128xf32> to vector<64x128xf32>
    %cst_34 = arith.constant dense<0.000000e+00> : vector<32x128xf32>
    %87 = tpu.matmul %78, %86, %cst_34 {dimension_numbers = #tpu.dot_dimension_numbers<[1], [0], [0], [1], [0, 0, 1, 1], [], []>} : vector<32x64xf32>, vector<64x128xf32>, vector<32x128xf32> -> vector<32x128xf32>
    %c1_35 = arith.constant 1 : index
    %c0_36 = arith.constant 0 : index
    %c0_37 = arith.constant 0 : index
    %88 = vector.load %arg6[%c1_35, %c0_36, %c0_37] : memref<3x64x128xf32, #tpu.memory_space<vmem>>, vector<1x64x128xf32>
    %89 = vector.shape_cast %88 : vector<1x64x128xf32> to vector<64x128xf32>
    %cst_38 = arith.constant dense<0.000000e+00> : vector<32x128xf32>
    %90 = tpu.matmul %0, %89, %cst_38 {dimension_numbers = #tpu.dot_dimension_numbers<[1], [0], [0], [1], [0, 0, 1, 1], [], []>} : vector<32x64xf32>, vector<64x128xf32>, vector<32x128xf32> -> vector<32x128xf32>
    %91 = arith.addf %87, %90 : vector<32x128xf32>
    %c2_39 = arith.constant 2 : index
    %c0_40 = arith.constant 0 : index
    %c0_41 = arith.constant 0 : index
    %92 = vector.load %arg6[%c2_39, %c0_40, %c0_41] : memref<3x64x128xf32, #tpu.memory_space<vmem>>, vector<1x64x128xf32>
    %93 = vector.shape_cast %92 : vector<1x64x128xf32> to vector<64x128xf32>
    %cst_42 = arith.constant dense<0.000000e+00> : vector<32x128xf32>
    %94 = tpu.matmul %84, %93, %cst_42 {dimension_numbers = #tpu.dot_dimension_numbers<[1], [0], [0], [1], [0, 0, 1, 1], [], []>} : vector<32x64xf32>, vector<64x128xf32>, vector<32x128xf32> -> vector<32x128xf32>
    %95 = arith.addf %91, %94 : vector<32x128xf32>
    %c0_43 = arith.constant 0 : index
    %c0_44 = arith.constant 0 : index
    %96 = vector.load %arg7[%c0_43, %c0_44] : memref<1x128xf32, #tpu.memory_space<vmem>>, vector<1x128xf32>
    %97 = vector.broadcast %96 : vector<1x128xf32> to vector<32x128xf32>
    %98 = arith.addf %95, %97 : vector<32x128xf32>
    %cst_45 = arith.constant 0.000000e+00 : f32
    %99 = vector.broadcast %cst_45 : f32 to vector<32x128xf32>
    %100 = arith.maximumf %98, %99 : vector<32x128xf32>
    %cst_46 = arith.constant 0.000000e+00 : f32
    %101 = vector.broadcast %cst_46 : f32 to vector<1x128xf32>
    %102 = vector.extract_strided_slice %50 {offsets = [0, 0], sizes = [31, 128], strides = [1, 1]} : vector<32x128xf32> to vector<31x128xf32>
    %103 = tpu.concatenate %101, %102 in 0 : vector<1x128xf32>, vector<31x128xf32> -> vector<32x128xf32>
    %104 = vector.extract_strided_slice %50 {offsets = [1, 0], sizes = [31, 128], strides = [1, 1]} : vector<32x128xf32> to vector<31x128xf32>
    %105 = tpu.concatenate %104, %101 in 0 : vector<31x128xf32>, vector<1x128xf32> -> vector<32x128xf32>
    %106 = tpu.iota {dimensions = array<i32: 0>} : vector<32x1xi32>
    %c16_i32_47 = arith.constant 16 : i32
    %c0_i32_48 = arith.constant 0 : i32
    %107 = arith.cmpi eq, %c16_i32_47, %c0_i32_48 : i32
    %c1_i32_49 = arith.constant 1 : i32
    %108 = arith.select %107, %c1_i32_49, %c16_i32_47 : i32
    %109 = vector.broadcast %108 : i32 to vector<32x1xi32>
    %110 = arith.remsi %106, %109 : vector<32x1xi32>
    %c0_i32_50 = arith.constant 0 : i32
    %111 = vector.broadcast %c0_i32_50 : i32 to vector<32x1xi32>
    %112 = arith.cmpi ne, %110, %111 : vector<32x1xi32>
    %c0_i32_51 = arith.constant 0 : i32
    %113 = vector.broadcast %c0_i32_51 : i32 to vector<32x1xi32>
    %114 = arith.cmpi slt, %110, %113 : vector<32x1xi32>
    %c0_i32_52 = arith.constant 0 : i32
    %115 = arith.cmpi slt, %108, %c0_i32_52 : i32
    %116 = vector.broadcast %115 : i1 to vector<32x1xi1>
    %117 = vector.broadcast %116 : vector<32x1xi1> to vector<32x1xi1>
    %118 = arith.xori %114, %117 : vector<32x1xi1>
    %119 = arith.andi %118, %112 : vector<32x1xi1>
    %120 = vector.broadcast %108 : i32 to vector<32x1xi32>
    %121 = arith.addi %110, %120 : vector<32x1xi32>
    %122 = arith.select %119, %121, %110 : vector<32x1xi1>, vector<32x1xi32>
    %c0_i32_53 = arith.constant 0 : i32
    %123 = vector.broadcast %c0_i32_53 : i32 to vector<32x1xi32>
    %124 = arith.cmpi eq, %122, %123 : vector<32x1xi32>
    %cst_54 = arith.constant 0.000000e+00 : f32
    %125 = vector.shape_cast %124 : vector<32x1xi1> to vector<32x1xi1>
    %126 = vector.broadcast %125 : vector<32x1xi1> to vector<32x128xi1>
    %127 = vector.broadcast %cst_54 : f32 to vector<32x128xf32>
    %128 = arith.select %126, %127, %103 : vector<32x128xi1>, vector<32x128xf32>
    %c15_i32_55 = arith.constant 15 : i32
    %129 = vector.broadcast %c15_i32_55 : i32 to vector<32x1xi32>
    %130 = arith.cmpi eq, %122, %129 : vector<32x1xi32>
    %cst_56 = arith.constant 0.000000e+00 : f32
    %131 = vector.shape_cast %130 : vector<32x1xi1> to vector<32x1xi1>
    %132 = vector.broadcast %131 : vector<32x1xi1> to vector<32x128xi1>
    %133 = vector.broadcast %cst_56 : f32 to vector<32x128xf32>
    %134 = arith.select %132, %133, %105 : vector<32x128xi1>, vector<32x128xf32>
    %c0_57 = arith.constant 0 : index
    %c0_58 = arith.constant 0 : index
    %c0_59 = arith.constant 0 : index
    %135 = vector.load %arg4[%c0_57, %c0_58, %c0_59] : memref<3x128x128xf32, #tpu.memory_space<vmem>>, vector<1x128x128xf32>
    %136 = vector.shape_cast %135 : vector<1x128x128xf32> to vector<128x128xf32>
    %cst_60 = arith.constant dense<0.000000e+00> : vector<32x128xf32>
    %137 = tpu.matmul %128, %136, %cst_60 {dimension_numbers = #tpu.dot_dimension_numbers<[1], [0], [0], [1], [0, 0, 1, 1], [], []>} : vector<32x128xf32>, vector<128x128xf32>, vector<32x128xf32> -> vector<32x128xf32>
    %c1_61 = arith.constant 1 : index
    %c0_62 = arith.constant 0 : index
    %c0_63 = arith.constant 0 : index
    %138 = vector.load %arg4[%c1_61, %c0_62, %c0_63] : memref<3x128x128xf32, #tpu.memory_space<vmem>>, vector<1x128x128xf32>
    %139 = vector.shape_cast %138 : vector<1x128x128xf32> to vector<128x128xf32>
    %cst_64 = arith.constant dense<0.000000e+00> : vector<32x128xf32>
    %140 = tpu.matmul %50, %139, %cst_64 {dimension_numbers = #tpu.dot_dimension_numbers<[1], [0], [0], [1], [0, 0, 1, 1], [], []>} : vector<32x128xf32>, vector<128x128xf32>, vector<32x128xf32> -> vector<32x128xf32>
    %141 = arith.addf %137, %140 : vector<32x128xf32>
    %c2_65 = arith.constant 2 : index
    %c0_66 = arith.constant 0 : index
    %c0_67 = arith.constant 0 : index
    %142 = vector.load %arg4[%c2_65, %c0_66, %c0_67] : memref<3x128x128xf32, #tpu.memory_space<vmem>>, vector<1x128x128xf32>
    %143 = vector.shape_cast %142 : vector<1x128x128xf32> to vector<128x128xf32>
    %cst_68 = arith.constant dense<0.000000e+00> : vector<32x128xf32>
    %144 = tpu.matmul %134, %143, %cst_68 {dimension_numbers = #tpu.dot_dimension_numbers<[1], [0], [0], [1], [0, 0, 1, 1], [], []>} : vector<32x128xf32>, vector<128x128xf32>, vector<32x128xf32> -> vector<32x128xf32>
    %145 = arith.addf %141, %144 : vector<32x128xf32>
    %c0_69 = arith.constant 0 : index
    %c0_70 = arith.constant 0 : index
    %146 = vector.load %arg5[%c0_69, %c0_70] : memref<1x128xf32, #tpu.memory_space<vmem>>, vector<1x128xf32>
    %147 = vector.broadcast %146 : vector<1x128xf32> to vector<32x128xf32>
    %148 = arith.addf %145, %147 : vector<32x128xf32>
    %cst_71 = arith.constant 0.000000e+00 : f32
    %149 = vector.broadcast %cst_71 : f32 to vector<32x128xf32>
    %150 = arith.maximumf %148, %149 : vector<32x128xf32>
    %151 = arith.addf %150, %100 : vector<32x128xf32>
    %cst_72 = arith.constant 0.000000e+00 : f32
    %152 = vector.broadcast %cst_72 : f32 to vector<32x128xf32>
    %153 = arith.maximumf %151, %152 : vector<32x128xf32>
    %c0_73 = arith.constant 0 : index
    %c0_74 = arith.constant 0 : index
    %154 = vector.load %arg8[%c0_73, %c0_74] : memref<32x128xf32, #tpu.memory_space<vmem>>, vector<32x128xf32>
    tpu.vector_store %arg8[%c0_73, %c0_74], %153 {strides = array<i32>} : memref<32x128xf32, #tpu.memory_space<vmem>>, vector<32x128xf32>,
    return
  }
  func.func @transform_0(%arg0: i32) -> (i32, i32) {
    %c0_i32 = arith.constant 0 : i32
    %c0_i32_0 = arith.constant 0 : i32
    return %arg0, %c0_i32 : i32, i32
  }
  func.func @transform_1(%arg0: i32) -> (i32, i32, i32) {
    %c0_i32 = arith.constant 0 : i32
    %c0_i32_0 = arith.constant 0 : i32
    %c0_i32_1 = arith.constant 0 : i32
    %c0_i32_2 = arith.constant 0 : i32
    return %c0_i32, %c0_i32_0, %c0_i32_1 : i32, i32, i32
  }
  func.func @transform_2(%arg0: i32) -> (i32, i32) {
    %c0_i32 = arith.constant 0 : i32
    %c0_i32_0 = arith.constant 0 : i32
    %c0_i32_1 = arith.constant 0 : i32
    return %c0_i32, %c0_i32_0 : i32, i32
  }
  func.func @transform_3(%arg0: i32) -> (i32, i32, i32) {
    %c0_i32 = arith.constant 0 : i32
    %c0_i32_0 = arith.constant 0 : i32
    %c0_i32_1 = arith.constant 0 : i32
    %c0_i32_2 = arith.constant 0 : i32
    return %c0_i32, %c0_i32_0, %c0_i32_1 : i32, i32, i32
  }
  func.func @transform_4(%arg0: i32) -> (i32, i32) {
    %c0_i32 = arith.constant 0 : i32
    %c0_i32_0 = arith.constant 0 : i32
    %c0_i32_1 = arith.constant 0 : i32
    return %c0_i32, %c0_i32_0 : i32, i32
  }
  func.func @transform_5(%arg0: i32) -> (i32, i32, i32) {
    %c0_i32 = arith.constant 0 : i32
    %c0_i32_0 = arith.constant 0 : i32
    %c0_i32_1 = arith.constant 0 : i32
    %c0_i32_2 = arith.constant 0 : i32
    return %c0_i32, %c0_i32_0, %c0_i32_1 : i32, i32, i32
  }
  func.func @transform_6(%arg0: i32) -> (i32, i32) {
    %c0_i32 = arith.constant 0 : i32
    %c0_i32_0 = arith.constant 0 : i32
    %c0_i32_1 = arith.constant 0 : i32
    return %c0_i32, %c0_i32_0 : i32, i32
  }
  func.func @transform_7(%arg0: i32) -> (i32, i32) {
    %c0_i32 = arith.constant 0 : i32
    %c0_i32_0 = arith.constant 0 : i32
    return %arg0, %c0_i32 : i32, i32
  }
}

</mosaic_0001>

<bundles_post_ra>
// kernel: normal_cell_nchw.1
= control target key start
LH: loop header
LB: loop body
LE: loop exit
PB: predicated region body
PF: predicated region fallthrough
CT: control target
= control target key end

     0   :  { %v60_v0 = vlaneseq  ;;  %vm34_vm0 = vcmask 1040384   ;;  %vm162_vm1 = vcmask 523264   ;;  %vm47_vm4 = vcmask 1046528   ;;  %s2347_s1 = inlined_call_operand.vmem [shape: f32[3,64,128], index: 1, kind: input, shape index: {}]   ;;  %s2348_s0 = inlined_call_operand.vmem [shape: f32[32,64], index: 0, kind: input, shape index: {}]   ;;  %s2349_s5 = inlined_call_operand.vmem [shape: f32[3,64,128], index: 5, kind: input, shape index: {}]   ;;  %s2350_s3 = inlined_call_operand.vmem [shape: f32[3,128,128], index: 3, kind: input, shape index: {}]   ;;  %s2351_s2 = inlined_call_operand.vmem [shape: f32[1,128], index: 2, kind: input, shape index: {}]   ;;  %s2352_s6 = inlined_call_operand.vmem [shape: f32[1,128], index: 6, kind: input, shape index: {}]   ;;  %s2353_s4 = inlined_call_operand.vmem [shape: f32[1,128], index: 4, kind: input, shape index: {}]   ;;  %s2354_s7 = inlined_call_operand.vmem [shape: f32[32,128], index: 7, kind: output, shape index: {}]  }
   0x1   :  { %v145_v1 = vld [vmem:[%s2347_s1] sm:$0xff]  ;;  %v146_v2 = vld [vmem:[%s2347_s1 + $0x8] sm:$0xff]  ;;  %v147_v3 = vld [vmem:[%s2347_s1 + $0x10] sm:$0xff] }
   0x2   :  { %v1647_v4 = vpack.c.bf16 %v146_v2, %v145_v1  ;;  %v148_v5 = vld [vmem:[%s2347_s1 + $0x18] sm:$0xff]  ;;  %v1899_v6 = vshrl.u32 %v60_v0, 7  ;;  %v149_v8 = vld [vmem:[%s2347_s1 + $0x20] sm:$0xff]  ;;  %v150_v9 = vld [vmem:[%s2347_s1 + $0x28] sm:$0xff] }
   0x3   :  { %v1651_v7 = vpack.c.bf16 %v148_v5, %v147_v3  ;;  %v1154_v10 = vld [vmem:[%s2347_s1 + $0x40] sm:$0xff]  ;;  %v1155_v11 = vld [vmem:[%s2347_s1 + $0x48] sm:$0xff]  ;;  %v1156_v16 = vld [vmem:[%s2347_s1 + $0x50] sm:$0xff]  ;;  %v1655_v17 = vpack.c.bf16 %v150_v9, %v149_v8 }
   0x4   :  { %1648 = vmatprep.subr.bf16.mxu0 %v1647_v4  ;;  %v1916_v12 = vld [vmem:[%s2348_s0] sm:$0xff]  ;;  %v69_v13 = vand.u32 15, %v1899_v6  ;;  %v1631_v14 = vpack.c.bf16 %v1155_v11, %v1154_v10  ;;  %v151_v18 = vld [vmem:[%s2347_s1 + $0x30] sm:$0xff]  ;;  %v1157_v20 = vld [vmem:[%s2347_s1 + $0x58] sm:$0xff]  ;;  %v63_v26 = vadd.s32 16, %v1899_v6  ;;  %v62_v62 = vadd.s32 8, %v1899_v6 }
   0x5   :  { %1650 = vmatpush3.bf16.msra.mxu0 %v1647_v4  ;;  %v35_v15 = vrot.slane %v1916_v12, 7  ;;  %1401 = vmatprep.mubr.msk.f32.mxu1 %vm162_vm1, %v1916_v12  ;;  %v152_v21 = vld [vmem:[%s2347_s1 + $0x38] sm:$0xff]  ;;  %v1635_v23 = vpack.c.bf16 %v1157_v20, %v1156_v16  ;;  %v1158_v24 = vld [vmem:[%s2347_s1 + $0x60] sm:$0xff]  ;;  %v1159_v25 = vld [vmem:[%s2347_s1 + $0x68] sm:$0xff]  ;;  %v48_v50 = vrot.slane %v1916_v12, 1  ;;  %v64_v4 = vadd.s32 24, %v1899_v6 }
   0x6   :  { %1652 = vmatprep.subr.bf16.mxu0 %v1651_v7  ;;  %vm1928_vm2 = vcmp.eq.s32.totalorder %v69_v13, 0  ;;  %1632 = vmatprep.subr.bf16.mxu1 %v1631_v14  ;;  %v1639_v28 = vpack.c.bf16 %v1159_v25, %v1158_v24  ;;  %v1955_v29 = vld [vmem:[%s2348_s0 + $0x10] sm:$0xff]  ;;  %v1659_v30 = vpack.c.bf16 %v152_v21, %v151_v18  ;;  %v1960_v31 = vld [vmem:[%s2348_s0 + $0x8] sm:$0xff]  ;;  %v1161_v33 = vld [vmem:[%s2347_s1 + $0x78] sm:$0xff]  ;;  %v83_v37 = vand.u32 15, %v63_v26 }
   0x7   :  { %v46_v22 = vsel %vm34_vm0, 0.0, %v35_v15  ;;  %1634 = vmatpush3.bf16.msra.mxu1 %v1631_v14  ;;  %v1160_v32 = vld [vmem:[%s2347_s1 + $0x70] sm:$0xff]  ;;  %v1170_v34 = vld [vmem:[%s2347_s1 + $0x80] sm:$0xff]  ;;  %v1171_v35 = vld [vmem:[%s2347_s1 + $0x88] sm:$0xff]  ;;  %v38_v36 = vrot.slane %v1955_v29, 7  ;;  %v36_v38 = vrot.slane %v1960_v31, 7 }
   0x8   :  { %v1948_v27 = vsel %vm1928_vm2, 0.0, %v46_v22  ;;  %1636 = vmatprep.subr.bf16.mxu1 %v1635_v23  ;;  %v1643_v39 = vpack.c.bf16 %v1161_v33, %v1160_v32  ;;  %v1663_v40 = vpack.c.bf16 %v1171_v35, %v1170_v34  ;;  %v1172_v41 = vld [vmem:[%s2347_s1 + $0x90] sm:$0xff]  ;;  %v1982_v42 = vld [vmem:[%s2348_s0 + $0x18] sm:$0xff]  ;;  %vm1988_vm3 = vcmp.eq.s32.totalorder %v83_v37, 0  ;;  %v1183_v46 = vld [vmem:[%s2349_s5 + $0x40] sm:$0xff] }
   0x9   :  { %1654 = vmatpush3.bf16.msra.mxu0 %v1651_v7  ;;  %1423 = vmatprep.mubr.msk.f32.mxu0 %vm162_vm1, %v1948_v27  ;;  %v1173_v43 = vld [vmem:[%s2347_s1 + $0x98] sm:$0xff]  ;;  %v39_v44 = vsel %vm34_vm0, %v36_v38, %v38_v36  ;;  %v1184_v47 = vld [vmem:[%s2349_s5 + $0x48] sm:$0xff]  ;;  %v1999_v48 = vsel %vm34_vm0, %v35_v15, %v36_v38  ;;  %v40_v49 = vrot.slane %v1982_v42, 7  ;;  %v49_v53 = vrot.slane %v1960_v31, 1  ;;  %v1174_v55 = vld [vmem:[%s2347_s1 + $0xa0] sm:$0xff] }
   0xa   :  { %1656 = vmatprep.subr.bf16.mxu0 %v1655_v17  ;;  %v1667_v51 = vpack.c.bf16 %v1173_v43, %v1172_v41  ;;  %v2005_v52 = vsel %vm1988_vm3, 0.0, %v39_v44  ;;  %v1679_v54 = vpack.c.bf16 %v1184_v47, %v1183_v46  ;;  %v1175_v56 = vld [vmem:[%s2347_s1 + $0xa8] sm:$0xff]  ;;  %v1185_v57 = vld [vmem:[%s2349_s5 + $0x50] sm:$0xff]  ;;  %v1186_v58 = vld [vmem:[%s2349_s5 + $0x58] sm:$0xff]  ;;  %v51_v7 = vrot.slane %v1955_v29, 1 }
   0xb   :  { %1638 = vmatpush3.bf16.msra.mxu1 %v1635_v23  ;;  %v2025_v59 = vsel %vm34_vm0, %v38_v36, %v40_v49  ;;  %v1671_v60 = vpack.c.bf16 %v1175_v56, %v1174_v55  ;;  %v2028_v61 = vsel %vm47_vm4, %v48_v50, %v49_v53  ;;  %v1176_v63 = vld [vmem:[%s2347_s1 + $0xb0] sm:$0xff]  ;;  %v1177_v0 = vld [vmem:[%s2347_s1 + $0xb8] sm:$0xff]  ;;  %v1683_v1 = vpack.c.bf16 %v1186_v58, %v1185_v57  ;;  %v1187_v2 = vld [vmem:[%s2349_s5 + $0x60] sm:$0xff] }
   0xc   :  { %1640 = vmatprep.subr.bf16.mxu1 %v1639_v28  ;;  %v1188_v3 = vld [vmem:[%s2349_s5 + $0x68] sm:$0xff]  ;;  %v1675_v5 = vpack.c.bf16 %v1177_v0, %v1176_v63  ;;  %v76_v8 = vand.u32 15, %v62_v62  ;;  %v814_v10 = vld [vmem:[%s2350_s3] sm:$0xff]  ;;  %v1189_v6 = vld [vmem:[%s2349_s5 + $0x70] sm:$0xff]  ;;  %v90_v14 = vand.u32 15, %v64_v4  ;;  %v52_v15 = vsel %vm47_vm4, %v49_v53, %v51_v7 }
   0xd   :  { %1658 = vmatpush3.bf16.msra.mxu0 %v1655_v17  ;;  %v1687_v9 = vpack.c.bf16 %v1188_v3, %v1187_v2  ;;  %v815_v11 = vld [vmem:[%s2350_s3 + $0x8] sm:$0xff]  ;;  %v1190_v13 = vld [vmem:[%s2349_s5 + $0x78] sm:$0xff]  ;;  %v53_v17 = vrot.slane %v1982_v42, 1  ;;  %v816_v21 = vld [vmem:[%s2350_s3 + $0x10] sm:$0xff] }
   0xe   :  { %1660 = vmatprep.subr.bf16.mxu0 %v1659_v30  ;;  %vm2070_vm5 = vcmp.eq.s32.totalorder %v76_v8, 15  ;;  %v1759_v18 = vpack.c.bf16 %v815_v11, %v814_v10  ;;  %v1691_v20 = vpack.c.bf16 %v1190_v13, %v1189_v6  ;;  %v478_v22 = vld [vmem:[%s2349_s5] sm:$0xff]  ;;  %v479_v23 = vld [vmem:[%s2349_s5 + $0x8] sm:$0xff]  ;;  %vm2095_vm6 = vcmp.eq.s32.totalorder %v90_v14, 15  ;;  %v480_v33 = vld [vmem:[%s2349_s5 + $0x10] sm:$0xff] }
   0xf   :  { %1642 = vmatpush3.bf16.msra.mxu1 %v1639_v28  ;;  %v2089_v24 = vsel %vm2070_vm5, 0.0, %v52_v15  ;;  %v2092_v25 = vsel %vm47_vm4, %v51_v7, %v53_v17  ;;  %v59_v26 = vsel %vm47_vm4, %v53_v17, 0.0  ;;  %v1695_v32 = vpack.c.bf16 %v479_v23, %v478_v22  ;;  %v481_v34 = vld [vmem:[%s2349_s5 + $0x18] sm:$0xff]  ;;  %v818_v35 = vld [vmem:[%s2350_s3 + $0x20] sm:$0xff]  ;;  %v819_v36 = vld [vmem:[%s2350_s3 + $0x28] sm:$0xff] }
  0x10   :  { %1644 = vmatprep.subr.bf16.mxu1 %v1643_v39  ;;  %v2117_v37 = vsel %vm2095_vm6, 0.0, %v59_v26  ;;  %v1699_v38 = vpack.c.bf16 %v481_v34, %v480_v33  ;;  %v483_v41 = vld [vmem:[%s2349_s5 + $0x28] sm:$0xff]  ;;  %v820_v43 = vld [vmem:[%s2350_s3 + $0x30] sm:$0xff]  ;;  %v821_v44 = vld [vmem:[%s2350_s3 + $0x38] sm:$0xff] }
  0x11   :  { %1662 = vmatpush3.bf16.msra.mxu0 %v1659_v30  ;;  %v1771_v47 = vpack.c.bf16 %v821_v44, %v820_v43  ;;  %v822_v49 = vld [vmem:[%s2350_s3 + $0x40] sm:$0xff]  ;;  %v823_v50 = vld [vmem:[%s2350_s3 + $0x48] sm:$0xff]  ;;  %v1202_v56 = vld [vmem:[%s2349_s5 + $0x98] sm:$0xff] }
  0x12   :  { %1664 = vmatprep.subr.bf16.mxu0 %v1663_v40  ;;  %v1200_v55 = vld [vmem:[%s2349_s5 + $0x88] sm:$0xff]  ;;  %v1203_v58 = vld [vmem:[%s2349_s5 + $0xa0] sm:$0xff]  ;;  %v1205_v63 = vld [vmem:[%s2349_s5 + $0xb0] sm:$0xff] }
  0x13   :  { %1646 = vmatpush3.bf16.msra.mxu1 %v1643_v39  ;;  %v482_v39 = vld [vmem:[%s2349_s5 + $0x20] sm:$0xff]  ;;  %v1206_v0 = vld [vmem:[%s2349_s5 + $0xb8] sm:$0xff]  ;;  %v1218_v8 = vld [vmem:[%s2350_s3 + $0xb0] sm:$0xff] }
  0x14   :  { %1424 = vmatmul.mubr.msk.f32.vlgmr.msra.gmra.mrb[0].mxu0 %vm162_vm1, %v1999_v48  ;;  %1680 = vmatprep.subr.bf16.mxu1 %v1679_v54  ;;  %v1703_v46 = vpack.c.bf16 %v483_v41, %v482_v39  ;;  %v1216_v4 = vld [vmem:[%s2350_s3 + $0xa0] sm:$0xff]  ;;  %v1221_v6 = vld [vmem:[%s2350_s3 + $0xc8] sm:$0xff]  ;;  %v1222_v14 = vld [vmem:[%s2350_s3 + $0xd0] sm:$0xff] }
  0x15   :  { %1666 = vmatpush3.bf16.msra.mxu0 %v1663_v40  ;;  %1426 = vmatprep.mubr.msk.f32.mxu0 %vm162_vm1, %v2005_v52  ;;  %v1767_v40 = vpack.c.bf16 %v819_v36, %v818_v35  ;;  %v1220_v11 = vld [vmem:[%s2350_s3 + $0xc0] sm:$0xff]  ;;  %v1223_v15 = vld [vmem:[%s2350_s3 + $0xd8] sm:$0xff]  ;;  %v1225_v22 = vld [vmem:[%s2350_s3 + $0xe8] sm:$0xff] }
  0x16   :  { %1668 = vmatprep.subr.bf16.mxu0 %v1667_v51  ;;  %1402 = vmatmul.mubr.msk.f32.vlgmr.msra.gmra.mrb[0].mxu1 %vm162_vm1, %v1960_v31  ;;  %v1743_v13 = vpack.c.bf16 %v1221_v6, %v1220_v11  ;;  %v1747_v17 = vpack.c.bf16 %v1223_v15, %v1222_v14  ;;  %v828_v34 = vld [vmem:[%s2350_s3 + $0x70] sm:$0xff]  ;;  %v829_v35 = vld [vmem:[%s2350_s3 + $0x78] sm:$0xff]  ;;  %vm1228_vm7 = vmneg %vm1928_vm2 }
  0x17   :  { %1404 = vmatprep.mubr.msk.f32.mxu1 %vm162_vm1, %v1955_v29  ;;  %1682 = vmatpush3.bf16.msra.mxu1 %v1679_v54  ;;  %v1199_v54 = vld [vmem:[%s2349_s5 + $0x80] sm:$0xff]  ;;  %v1787_v36 = vpack.c.bf16 %v829_v35, %v828_v34  ;;  %vm1230_vm8 = vmneg %vm1988_vm3  ;;  %v1239_v45 = vld [vmem:[%s2350_s3 + $0x138] sm:$0xff] }
  0x18   :  { %1427 = vmatmul.mubr.msk.f32.gmra.mrb[2].mxu0 %vm162_vm1, %v2025_v59  ;;  %1684 = vmatprep.subr.bf16.mxu1 %v1683_v1  ;;  %v1236_v19 = vld [vmem:[%s2350_s3 + $0x120] sm:$0xff]  ;;  %vm1248_vm9 = vmneg %vm2070_vm5 }
  0x19   :  { %1670 = vmatpush3.bf16.msra.mxu0 %v1667_v51  ;;  %1445 = vmatprep.mubr.msk.f32.mxu0 %vm162_vm1, %v2028_v61  ;;  %v1775_v51 = vpack.c.bf16 %v823_v50, %v822_v49  ;;  %vm1250_vm10 = vmneg %vm2095_vm6 }
  0x1a   :  { %1672 = vmatprep.subr.bf16.mxu0 %v1671_v60  ;;  %1405 = vmatmul.mubr.msk.f32.gmra.mrb[2].mxu1 %vm162_vm1, %v1982_v42 }
  0x1b   :  { %1467 = vmatprep.mubr.msk.f32.mxu1 %vm162_vm1, %v1916_v12  ;;  %1686 = vmatpush3.bf16.msra.mxu1 %v1683_v1  ;;  %v817_v12 = vld [vmem:[%s2350_s3 + $0x18] sm:$0xff]  ;;  %v1213_v1 = vld [vmem:[%s2350_s3 + $0x88] sm:$0xff] }
  0x1c   :  { %1688 = vmatprep.subr.bf16.mxu1 %v1687_v9  ;;  %v1763_v30 = vpack.c.bf16 %v817_v12, %v816_v21  ;;  %v1224_v12 = vld [vmem:[%s2350_s3 + $0xe0] sm:$0xff] }
  0x1d   :  { %1674 = vmatpush3.bf16.msra.mxu0 %v1671_v60  ;;  %v1204_v60 = vld [vmem:[%s2349_s5 + $0xa8] sm:$0xff]  ;;  %v1751_v23 = vpack.c.bf16 %v1225_v22, %v1224_v12  ;;  %v1242_v22 = vld [vmem:[%s2350_s3 + $0x150] sm:$0xff] }
  0x1e   :  { %1676 = vmatprep.subr.bf16.mxu0 %v1675_v5  ;;  %v1719_v62 = vpack.c.bf16 %v1204_v60, %v1203_v58  ;;  %v1235_v58 = vld [vmem:[%s2350_s3 + $0x118] sm:$0xff] }
  0x1f   :  { %1690 = vmatpush3.bf16.msra.mxu1 %v1687_v9  ;;  %v1219_v9 = vld [vmem:[%s2350_s3 + $0xb8] sm:$0xff] }
  0x20   :  { %1692 = vmatprep.subr.bf16.mxu1 %v1691_v20  ;;  %v1739_v10 = vpack.c.bf16 %v1219_v9, %v1218_v8 }
  0x21   :  { %1678 = vmatpush3.bf16.msra.mxu0 %v1675_v5  ;;  %v1217_v5 = vld [vmem:[%s2350_s3 + $0xa8] sm:$0xff] }
  0x22   :  { %1760 = vmatprep.subr.bf16.mxu0 %v1759_v18  ;;  %v1735_v7 = vpack.c.bf16 %v1217_v5, %v1216_v4  ;;  %v1237_v5 = vld [vmem:[%s2350_s3 + $0x128] sm:$0xff] }
  0x23   :  { %1694 = vmatpush3.bf16.msra.mxu1 %v1691_v20  ;;  %v825_v20 = vld [vmem:[%s2350_s3 + $0x58] sm:$0xff]  ;;  %v1799_v11 = vpack.c.bf16 %v1237_v5, %v1236_v19 }
  0x24   :  { %1446 = vmatmul.mubr.msk.f32.vlgmr.msra.gmra.mrb[0].mxu0 %vm162_vm1, %v2089_v24  ;;  %1696 = vmatprep.subr.bf16.mxu1 %v1695_v32 }
  0x25   :  { %1448 = vmatprep.mubr.msk.f32.mxu0 %vm162_vm1, %v2092_v25  ;;  %1762 = vmatpush3.bf16.msra.mxu0 %v1759_v18  ;;  %v824_v18 = vld [vmem:[%s2350_s3 + $0x50] sm:$0xff] }
  0x26   :  { %1764 = vmatprep.subr.bf16.mxu0 %v1763_v30  ;;  %1468 = vmatmul.mubr.msk.f32.vlgmr.msra.gmra.mrb[4].mxu1 %vm162_vm1, %v1960_v31  ;;  %v484_v31 = vld [vmem:[%s2349_s5 + $0x30] sm:$0xff]  ;;  %v1779_v21 = vpack.c.bf16 %v825_v20, %v824_v18  ;;  %v1240_v20 = vld [vmem:[%s2350_s3 + $0x140] sm:$0xff] }
  0x27   :  { %1698 = vmatpush3.bf16.msra.mxu1 %v1695_v32  ;;  %1470 = vmatprep.mubr.msk.f32.mxu1 %vm162_vm1, %v1955_v29  ;;  %v485_v29 = vld [vmem:[%s2349_s5 + $0x38] sm:$0xff] }
  0x28   :  { %1449 = vmatmul.mubr.msk.f32.gmra.mrb[2].mxu0 %vm162_vm1, %v2117_v37  ;;  %1700 = vmatprep.subr.bf16.mxu1 %v1699_v38  ;;  %v1707_v53 = vpack.c.bf16 %v485_v29, %v484_v31  ;;  %v1227_v32 = vld [vmem:[%s2350_s3 + $0xf8] sm:$0xff] }
  0x29   :  { %1766 = vmatpush3.bf16.msra.mxu0 %v1763_v30  ;;  %v1226_v30 = vld [vmem:[%s2350_s3 + $0xf0] sm:$0xff] }
  0x2a   :  { %1768 = vmatprep.subr.bf16.mxu0 %v1767_v40  ;;  %1471 = vmatmul.mubr.msk.f32.gmra.mrb[6].mxu1 %vm162_vm1, %v1982_v42  ;;  %v1711_v42 = vpack.c.bf16 %v1200_v55, %v1199_v54  ;;  %v1755_v33 = vpack.c.bf16 %v1227_v32, %v1226_v30  ;;  %v1246_v32 = vld [vmem:[%s2350_s3 + $0x170] sm:$0xff] }
  0x2b   :  { %1702 = vmatpush3.bf16.msra.mxu1 %v1699_v38  ;;  %1489 = vmatprep.mubr.msk.f32.mxu1 %vm162_vm1, %v1948_v27  ;;  %v1201_v27 = vld [vmem:[%s2349_s5 + $0x90] sm:$0xff]  ;;  %v1233_v38 = vld [vmem:[%s2350_s3 + $0x108] sm:$0xff] }
  0x2c   :  { %1704 = vmatprep.subr.bf16.mxu1 %v1703_v46  ;;  %v1715_v57 = vpack.c.bf16 %v1202_v56, %v1201_v27 }
  0x2d   :  { %1770 = vmatpush3.bf16.msra.mxu0 %v1767_v40 }
  0x2e   :  { %1772 = vmatprep.subr.bf16.mxu0 %v1771_v47 }
  0x2f   :  { %1706 = vmatpush3.bf16.msra.mxu1 %v1703_v46 }
  0x30   :  { %1708 = vmatprep.subr.bf16.mxu1 %v1707_v53 }
  0x31   :  { %1774 = vmatpush3.bf16.msra.mxu0 %v1771_v47  ;;  %v1182_v47 = vld [vmem:[%s2351_s2] ss:$0 sm:$0xff] }
  0x32   :  { %1776 = vmatprep.subr.bf16.mxu0 %v1775_v51 }
  0x33   :  { %1710 = vmatpush3.bf16.msra.mxu1 %v1707_v53 }
  0x34   :  { %1712 = vmatprep.subr.bf16.mxu1 %v1711_v42 }
  0x35   :  { %1778 = vmatpush3.bf16.msra.mxu0 %v1775_v51 }
  0x36   :  { %1490 = vmatmul.mubr.msk.f32.vlgmr.msra.gmra.mrb[4].mxu1 %vm162_vm1, %v1999_v48  ;;  %v1723_v48 = vpack.c.bf16 %v1206_v0, %v1205_v63  ;;  %1780 = vmatprep.subr.bf16.mxu0 %v1779_v21 }
  0x37   :  { %1714 = vmatpush3.bf16.msra.mxu1 %v1711_v42  ;;  %1492 = vmatprep.mubr.msk.f32.mxu1 %vm162_vm1, %v2005_v52  ;;  %v1212_v52 = vld [vmem:[%s2350_s3 + $0x80] sm:$0xff] }
  0x38   :  { %1716 = vmatprep.subr.bf16.mxu1 %v1715_v57  ;;  %v1727_v2 = vpack.c.bf16 %v1213_v1, %v1212_v52 }
  0x39   :  { %1782 = vmatpush3.bf16.msra.mxu0 %v1779_v21  ;;  %v1241_v21 = vld [vmem:[%s2350_s3 + $0x148] sm:$0xff] }
  0x3a   :  { %1493 = vmatmul.mubr.msk.f32.gmra.mrb[6].mxu1 %vm162_vm1, %v2025_v59  ;;  %v1214_v59 = vld [vmem:[%s2350_s3 + $0x90] sm:$0xff]  ;;  %v1807_v12 = vpack.c.bf16 %v1241_v21, %v1240_v20 }
  0x3b   :  { %1718 = vmatpush3.bf16.msra.mxu1 %v1715_v57  ;;  %1511 = vmatprep.mubr.msk.f32.mxu1 %vm162_vm1, %v2028_v61  ;;  %v1215_v61 = vld [vmem:[%s2350_s3 + $0x98] sm:$0xff]  ;;  %v1234_v57 = vld [vmem:[%s2350_s3 + $0x110] sm:$0xff] }
  0x3c   :  { %1720 = vmatprep.subr.bf16.mxu1 %v1719_v62  ;;  %v1731_v3 = vpack.c.bf16 %v1215_v61, %v1214_v59 }
  0x3f   :  { %1722 = vmatpush3.bf16.msra.mxu1 %v1719_v62 }
  0x40   :  { %1724 = vmatprep.subr.bf16.mxu1 %v1723_v48 }
  0x43   :  { %1726 = vmatpush3.bf16.msra.mxu1 %v1723_v48 }
  0x44   :  { %1728 = vmatprep.subr.bf16.mxu1 %v1727_v2 }
  0x46   :  { %1512 = vmatmul.mubr.msk.f32.vlgmr.msra.gmra.mrb[4].mxu1 %vm162_vm1, %v2089_v24  ;;  %v826_v24 = vld [vmem:[%s2350_s3 + $0x60] sm:$0xff] }
  0x47   :  { %1730 = vmatpush3.bf16.msra.mxu1 %v1727_v2  ;;  %1514 = vmatprep.mubr.msk.f32.mxu1 %vm162_vm1, %v2092_v25  ;;  %v827_v25 = vld [vmem:[%s2350_s3 + $0x68] sm:$0xff]  ;;  %v1795_v2 = vpack.c.bf16 %v1235_v58, %v1234_v57 }
  0x48   :  { %1732 = vmatprep.subr.bf16.mxu1 %v1731_v3  ;;  %v1783_v26 = vpack.c.bf16 %v827_v25, %v826_v24  ;;  %v1244_v25 = vld [vmem:[%s2350_s3 + $0x160] sm:$0xff] }
  0x4a   :  { %1515 = vmatmul.mubr.msk.f32.gmra.mrb[6].mxu1 %vm162_vm1, %v2117_v37  ;;  %1784 = vmatprep.subr.bf16.mxu0 %v1783_v26  ;;  %v1232_v37 = vld [vmem:[%s2350_s3 + $0x100] sm:$0xff] }
  0x4b   :  { %1734 = vmatpush3.bf16.msra.mxu1 %v1731_v3  ;;  %1786 = vmatpush3.bf16.msra.mxu0 %v1783_v26  ;;  %v1791_v39 = vpack.c.bf16 %v1233_v38, %v1232_v37  ;;  %v1245_v26 = vld [vmem:[%s2350_s3 + $0x168] sm:$0xff] }
  0x4c   :  { %1736 = vmatprep.subr.bf16.mxu1 %v1735_v7  ;;  %1788 = vmatprep.subr.bf16.mxu0 %v1787_v36  ;;  %v1815_v30 = vpack.c.bf16 %v1245_v26, %v1244_v25 }
  0x4f   :  { %1738 = vmatpush3.bf16.msra.mxu1 %v1735_v7  ;;  %1790 = vmatpush3.bf16.msra.mxu0 %v1787_v36 }
  0x50   :  { %1740 = vmatprep.subr.bf16.mxu1 %v1739_v10  ;;  %1792 = vmatprep.subr.bf16.mxu0 %v1791_v39 }
  0x53   :  { %1742 = vmatpush3.bf16.msra.mxu1 %v1739_v10 }
  0x54   :  { %1744 = vmatprep.subr.bf16.mxu1 %v1743_v13 }
  0x57   :  { %1746 = vmatpush3.bf16.msra.mxu1 %v1743_v13 }
  0x58   :  { %1748 = vmatprep.subr.bf16.mxu1 %v1747_v17 }
  0x5b   :  { %1750 = vmatpush3.bf16.msra.mxu1 %v1747_v17  ;;  %v1238_v17 = vld [vmem:[%s2350_s3 + $0x130] sm:$0xff] }
  0x5c   :  { %1752 = vmatprep.subr.bf16.mxu1 %v1751_v23  ;;  %v1803_v18 = vpack.c.bf16 %v1239_v45, %v1238_v17 }
  0x5f   :  { %1754 = vmatpush3.bf16.msra.mxu1 %v1751_v23  ;;  %v1243_v23 = vld [vmem:[%s2350_s3 + $0x158] sm:$0xff] }
  0x60   :  { %1756 = vmatprep.subr.bf16.mxu1 %v1755_v33  ;;  %v1811_v24 = vpack.c.bf16 %v1243_v23, %v1242_v22 }
  0x63   :  { %1758 = vmatpush3.bf16.msra.mxu1 %v1755_v33  ;;  %v1247_v33 = vld [vmem:[%s2350_s3 + $0x178] sm:$0xff] }
  0x64   :  { %v1819_v34 = vpack.c.bf16 %v1247_v33, %v1246_v32 }
  0xe9   :  { %v1403_v40 = vpop.f32.mrb[0].mxu1 }
  0xea   :  { %v237_v41 = vpop.f32.mrb[1].mxu1 }
  0xed   :  { %v1406_v43 = vpop.f32.mrb[2].mxu1 }
  0xee   :  { %v247_v44 = vpop.f32.mrb[3].mxu1 }
  0xf7   :  { %v1447_v46 = vpop.f32.mrb[0].mxu0 }
  0xf8   :  { %v1823_v49 = vadd.f32 %v1447_v46, %v1403_v40  ;;  %v440_v50 = vpop.f32.mrb[1].mxu0  ;;  %v1211_v46 = vld [vmem:[%s2352_s6] ss:$0 sm:$0xff] }
  0xf9   :  { %v1824_v31 = vadd.f32 %v440_v50, %v237_v41 }
  0xfa   :  { %v471_v29 = vadd.f32 %v1823_v49, %v1182_v47 }
  0xfb   :  { %v470_v51 = vadd.f32 %v1824_v31, %v1182_v47  ;;  %v1450_v53 = vpop.f32.mrb[2].mxu0 }
  0xfc   :  { %v475_v54 = vmax.f32 %v471_v29, 0.0  ;;  %v1825_v55 = vadd.f32 %v1450_v53, %v1406_v43  ;;  %v450_v42 = vpop.f32.mrb[3].mxu0 }
  0xfd   :  { %v474_v27 = vmax.f32 %v470_v51, 0.0  ;;  %v1826_v56 = vadd.f32 %v450_v42, %v247_v44 }
  0xfe   :  { %v783_v60 = vrot.slane %v475_v54, 7  ;;  %v473_v62 = vadd.f32 %v1825_v55, %v1182_v47  ;;  %v795_v63 = vrot.slane %v475_v54, 1 }
  0xff   :  { %v472_v0 = vadd.f32 %v1826_v56, %v1182_v47  ;;  %1549 = vmatprep.mubr.f32.mxu1 %v474_v27  ;;  %v782_v48 = vrot.slane %v474_v27, 7  ;;  %v794_v52 = vrot.slane %v474_v27, 1  ;;  %v1252_v47 = vld [vmem:[%s2353_s4] ss:$0 sm:$0xff] }
 0x100   :  { %v2274_v1 = vmax.f32 %v473_v62, 0.0  ;;  %1550 = vmatmul.mubr.f32.vlgmr.msra.gmra.mrb[8].mxu1 %v475_v54 }
 0x101   :  { %v476_v59 = vmax.f32 %v472_v0, 0.0  ;;  %v793_v61 = vsel %vm34_vm0, 0.0, %v782_v48  ;;  %v784_v3 = vsel %vm34_vm0, %v782_v48, %v783_v60  ;;  %v796_v4 = vsel %vm47_vm4, %v794_v52, %v795_v63 }
 0x102   :  { %1587 = vmatprep.mubr.msk.f32.mxu0 %vm1228_vm7, %v793_v61  ;;  %v787_v7 = vrot.slane %v2274_v1, 7  ;;  %v799_v8 = vrot.slane %v2274_v1, 1 }
 0x103   :  { %v785_v9 = vrot.slane %v476_v59, 7  ;;  %v797_v10 = vrot.slane %v476_v59, 1  ;;  %1552 = vmatprep.mubr.f32.mxu1 %v476_v59  ;;  %1588 = vmatmul.mubr.f32.vlgmr.msra.gmra.mrb[4].mxu0 %v784_v3 }
 0x104   :  { %1794 = vmatpush3.bf16.msra.mxu0 %v1791_v39  ;;  %1553 = vmatmul.mubr.f32.gmra.mrb[10].mxu1 %v2274_v1  ;;  %v805_v39 = vsel %vm47_vm4, %v799_v8, 0.0 }
 0x105   :  { %v786_v6 = vsel %vm34_vm0, %v783_v60, %v785_v9  ;;  %1796 = vmatprep.subr.bf16.mxu0 %v1795_v2  ;;  %v788_v13 = vsel %vm34_vm0, %v785_v9, %v787_v7  ;;  %v798_v14 = vsel %vm47_vm4, %v795_v63, %v797_v10  ;;  %v800_v15 = vsel %vm47_vm4, %v797_v10, %v799_v8 }
 0x106   :  { %1590 = vmatprep.mubr.msk.f32.mxu0 %vm1230_vm8, %v786_v6 }
 0x107   :  { %1591 = vmatmul.mubr.f32.gmra.mrb[6].mxu0 %v788_v13 }
 0x108   :  { %1798 = vmatpush3.bf16.msra.mxu0 %v1795_v2  ;;  %1625 = vmatprep.mubr.f32.mxu0 %v796_v4 }
 0x109   :  { %1800 = vmatprep.subr.bf16.mxu0 %v1799_v11 }
 0x10c   :  { %1802 = vmatpush3.bf16.msra.mxu0 %v1799_v11 }
 0x10d   :  { %1804 = vmatprep.subr.bf16.mxu0 %v1803_v18 }
 0x110   :  { %1806 = vmatpush3.bf16.msra.mxu0 %v1803_v18 }
 0x111   :  { %1808 = vmatprep.subr.bf16.mxu0 %v1807_v12 }
 0x114   :  { %1810 = vmatpush3.bf16.msra.mxu0 %v1807_v12 }
 0x115   :  { %1812 = vmatprep.subr.bf16.mxu0 %v1811_v24 }
 0x118   :  { %1814 = vmatpush3.bf16.msra.mxu0 %v1811_v24 }
 0x119   :  { %1816 = vmatprep.subr.bf16.mxu0 %v1815_v30  ;;  %v1513_v35 = vpop.f32.mrb[4].mxu1 }
 0x11a   :  { %v740_v36 = vpop.f32.mrb[5].mxu1  ;;  %v771_v49 = vadd.f32 %v1513_v35, %v1211_v46 }
 0x11b   :  { %v770_v31 = vadd.f32 %v1211_v46, %v740_v36 }
 0x11c   :  { %1818 = vmatpush3.bf16.msra.mxu0 %v1815_v30  ;;  %v775_v55 = vmax.f32 %v771_v49, 0.0 }
 0x11d   :  { %1820 = vmatprep.subr.bf16.mxu0 %v1819_v34  ;;  %v1516_v37 = vpop.f32.mrb[6].mxu1  ;;  %v774_v58 = vmax.f32 %v770_v31, 0.0 }
 0x11e   :  { %v750_v38 = vpop.f32.mrb[7].mxu1  ;;  %v773_v42 = vadd.f32 %v1516_v37, %v1211_v46 }
 0x11f   :  { %v772_v60 = vadd.f32 %v1211_v46, %v750_v38 }
 0x120   :  { %1822 = vmatpush3.bf16.msra.mxu0 %v1819_v34  ;;  %v777_v2 = vmax.f32 %v773_v42, 0.0 }
 0x121   :  { %v776_v3 = vmax.f32 %v772_v60, 0.0 }
 0x123   :  { %1626 = vmatmul.mubr.msk.f32.vlgmr.msra.gmra.mrb[4].mxu0 %vm1248_vm9, %v798_v14 }
 0x124   :  { %1628 = vmatprep.mubr.f32.mxu0 %v800_v15 }
 0x127   :  { %1629 = vmatmul.mubr.msk.f32.gmra.mrb[6].mxu0 %vm1250_vm10, %v805_v39 }
 0x1d3   :  { %v1551_v40 = vpop.f32.mrb[8].mxu1 }
 0x1d4   :  { %v913_v41 = vpop.f32.mrb[9].mxu1 }
 0x1d7   :  { %v1554_v43 = vpop.f32.mrb[10].mxu1 }
 0x1d8   :  { %v923_v44 = vpop.f32.mrb[11].mxu1 }
 0x1f6   :  { %v1627_v16 = vpop.f32.mrb[4].mxu0 }
 0x1f7   :  { %v1827_v50 = vadd.f32 %v1627_v16, %v1551_v40  ;;  %v1100_v28 = vpop.f32.mrb[5].mxu0 }
 0x1f8   :  { %v1828_v29 = vadd.f32 %v1100_v28, %v913_v41 }
 0x1f9   :  { %v1131_v51 = vadd.f32 %v1827_v50, %v1252_v47 }
 0x1fa   :  { %v1130_v53 = vadd.f32 %v1828_v29, %v1252_v47  ;;  %v1630_v54 = vpop.f32.mrb[6].mxu0 }
 0x1fb   :  { %v1135_v27 = vmax.f32 %v1131_v51, 0.0  ;;  %v1829_v56 = vadd.f32 %v1630_v54, %v1554_v43  ;;  %v1110_v57 = vpop.f32.mrb[7].mxu0 }
 0x1fc   :  { %v1134_v62 = vmax.f32 %v1130_v53, 0.0  ;;  %v1830_v63 = vadd.f32 %v1110_v57, %v923_v44 }
 0x1fd   :  { %v1139_v0 = vadd.f32 %v1135_v27, %v775_v55  ;;  %v1133_v48 = vadd.f32 %v1829_v56, %v1252_v47 }
 0x1fe   :  { %v1138_v52 = vadd.f32 %v1134_v62, %v774_v58  ;;  %v1132_v1 = vadd.f32 %v1830_v63, %v1252_v47 }
 0x1ff   :  { %v1143_v59 = vmax.f32 %v1139_v0, 0.0  ;;  %v1137_v61 = vmax.f32 %v1133_v48, 0.0 }
 0x200   :  { %v1142_v4 = vmax.f32 %v1138_v52, 0.0  ;;  %v1136_v19 = vmax.f32 %v1132_v1, 0.0 }
 0x201   :  { %1147 = vst [vmem:[%s2354_s7 + $0x8] sm:$0xff] %v1143_v59  ;;  %v1141_v5 = vadd.f32 %v1137_v61, %v777_v2 }
 0x202   :  { %1146 = vst [vmem:[%s2354_s7] sm:$0xff] %v1142_v4  ;;  %v1140_v7 = vadd.f32 %v1136_v19, %v776_v3 }
 0x203   :  { %v1145_v8 = vmax.f32 %v1141_v5, 0.0 }
 0x204   :  { %v1144_v9 = vmax.f32 %v1140_v7, 0.0 }
 0x205   :  { %1149 = vst [vmem:[%s2354_s7 + $0x18] sm:$0xff] %v1145_v8 }
 0x206   :  { %1148 = vst [vmem:[%s2354_s7 + $0x10] sm:$0xff] %v1144_v9 }

</bundles_post_ra>
